<compile_context>
chip_gen: v5e
topology: v5e:2x2
jax: 0.10.0
libtpu: 0.0.40
codegen_flags: <defaults>
</compile_context>

<pallas_src>
import math

import jax
import jax.numpy as jnp
from jax.experimental import pallas as pl
from jax.experimental.pallas import tpu as pltpu


def _round_up(x, m):
    return (x + m - 1) // m * m


# ---------------------------------------------------------------------------
# Phase 0: X_prime = X @ W; also emit (attention_w * X_prime)^T for the SDDMM rhs.
# ---------------------------------------------------------------------------
def _xprime_kernel(x_ref, w_ref, attw_ref, xp_ref, xpt_ref):
    xp = jnp.dot(x_ref[...], w_ref[...], preferred_element_type=jnp.float32)
    xp_ref[...] = xp.astype(jnp.bfloat16)
    # Fold the scalar attention weight into one SDDMM operand once (O(N*F) instead
    # of scaling the O(N^2) score matrix), and pre-transpose so phases 1/2 do a
    # plain row-major matmul with no per-tile transpose.
    xpt_ref[...] = (xp * attw_ref[0]).T.astype(jnp.bfloat16)


# ---------------------------------------------------------------------------
# Phase 1: global min / max of edge attention scores.
# ---------------------------------------------------------------------------
def _minmax_kernel(xp_row_ref, xpt_col_ref, adj_ref, mx_ref, mn_ref):
    i = pl.program_id(0)
    j = pl.program_id(1)

    @pl.when(jnp.logical_and(i == 0, j == 0))
    def _():
        mx_ref[...] = jnp.full(mx_ref.shape, -jnp.inf, dtype=mx_ref.dtype)
        mn_ref[...] = jnp.full(mn_ref.shape, jnp.inf, dtype=mn_ref.dtype)

    # SDDMM tile (attention_w already folded into the transposed operand).
    s = jnp.dot(xp_row_ref[...], xpt_col_ref[...],
                preferred_element_type=jnp.float32)
    edge = adj_ref[...].astype(jnp.float32) > 0.0
    tmax = jnp.max(jnp.where(edge, s, -jnp.inf), keepdims=True)
    tmin = jnp.min(jnp.where(edge, s, jnp.inf), keepdims=True)
    mx_ref[...] = jnp.maximum(mx_ref[...], tmax)
    mn_ref[...] = jnp.minimum(mn_ref[...], tmin)


# ---------------------------------------------------------------------------
# Phase 2: exp-normalized attention, SpMM aggregation, row-sum normalization.
# ---------------------------------------------------------------------------
def _agg_kernel(xp_row_ref, xpt_col_ref, xp_col_ref, adj_ref, scal_ref,
                out_ref, acc_ref, rsum_ref):
    j = pl.program_id(1)
    nj = pl.num_programs(1)

    @pl.when(j == 0)
    def _():
        acc_ref[...] = jnp.zeros_like(acc_ref)
        rsum_ref[...] = jnp.zeros_like(rsum_ref)

    min_v = scal_ref[0]
    inv_range = scal_ref[1]

    # Recompute the SDDMM tile (cheaper than storing/reloading an N^2 score matrix).
    s = jnp.dot(xp_row_ref[...], xpt_col_ref[...],
                preferred_element_type=jnp.float32)
    e = (s - min_v) * inv_range
    edge = adj_ref[...].astype(jnp.float32) > 0.0
    # Mask BEFORE the exp: exp(-inf) == 0 exactly, so non-edges contribute nothing
    # and no inf can reach the accumulators.
    e = jnp.where(edge, e, -jnp.inf)
    att = jnp.exp(e)

    rsum_ref[...] += jnp.sum(att, axis=1, keepdims=True)
    acc_ref[...] += jnp.dot(att.astype(jnp.bfloat16), xp_col_ref[...],
                            preferred_element_type=jnp.float32)

    @pl.when(j == nj - 1)
    def _():
        rs = rsum_ref[...]
        res = acc_ref[...] / rs
        # Guard zero-degree (or padded) rows; the reference would emit inf/nan here.
        out_ref[...] = jnp.where(rs > 0.0, res, 0.0)


# ---------------------------------------------------------------------------
# Wrapper
# ---------------------------------------------------------------------------
def agnn_conv(X, weights, adj, attention_w):
    """AGNNConv forward. Returns float16 like the reference's .half()."""
    N, f_in = X.shape
    f_out = weights.shape[1]

    # Tile sizes: lane-dense 128-multiples; row/col tile capped at 256 (fits v7x's
    # 64 MiB VMEM comfortably with double-buffered inputs, good for v5e/v6e too).
    tile = min(256, _round_up(N, 128))
    n_pad = _round_up(N, tile)
    fi_pad = _round_up(f_in, 128)
    fo_pad = _round_up(f_out, 128)
    n_tiles = n_pad // tile

    # Zero-padded, bf16 MXU operands; adjacency mask in bf16 (halves the O(N^2) stream).
    x_p = jnp.zeros((n_pad, fi_pad), jnp.bfloat16).at[:N, :f_in].set(
        X.astype(jnp.bfloat16))
    w_p = jnp.zeros((fi_pad, fo_pad), jnp.bfloat16).at[:f_in, :f_out].set(
        weights.astype(jnp.bfloat16))
    adj_p = jnp.zeros((n_pad, n_pad), jnp.bfloat16).at[:N, :N].set(
        adj.astype(jnp.bfloat16))
    attw = jnp.asarray(attention_w, jnp.float32).reshape((1,))

    # ---- Phase 0: X_prime (row-major) and attention_w * X_prime^T ----
    xp, xpt = pl.pallas_call(
        _xprime_kernel,
        out_shape=(jax.ShapeDtypeStruct((n_pad, fo_pad), jnp.bfloat16),
                   jax.ShapeDtypeStruct((fo_pad, n_pad), jnp.bfloat16)),
        grid=(n_tiles,),
        in_specs=[
            pl.BlockSpec((tile, fi_pad), lambda i: (i, 0)),
            pl.BlockSpec((fi_pad, fo_pad), lambda i: (0, 0)),
            pl.BlockSpec(memory_space=pltpu.MemorySpace.SMEM),
        ],
        out_specs=(pl.BlockSpec((tile, fo_pad), lambda i: (i, 0)),
                   pl.BlockSpec((fo_pad, tile), lambda i: (0, i))),
        compiler_params=pltpu.CompilerParams(
            dimension_semantics=("parallel",)),
    )(x_p, w_p, attw)

    # ---- Phase 1: global min / max over edge scores ----
    mx, mn = pl.pallas_call(
        _minmax_kernel,
        out_shape=(jax.ShapeDtypeStruct((1, 128), jnp.float32),
                   jax.ShapeDtypeStruct((1, 128), jnp.float32)),
        grid=(n_tiles, n_tiles),
        in_specs=[
            pl.BlockSpec((tile, fo_pad), lambda i, j: (i, 0)),   # X_prime row panel
            pl.BlockSpec((fo_pad, tile), lambda i, j: (0, j)),   # scaled X_prime^T col panel
            pl.BlockSpec((tile, tile), lambda i, j: (i, j)),     # adjacency tile
        ],
        out_specs=(pl.BlockSpec((1, 128), lambda i, j: (0, 0)),
                   pl.BlockSpec((1, 128), lambda i, j: (0, 0))),
        compiler_params=pltpu.CompilerParams(
            dimension_semantics=("arbitrary", "arbitrary")),
    )(xp, xpt, adj_p)

    max_v = mx[0, 0]
    min_v = mn[0, 0]
    rng = max_v - min_v
    # Hoist the range reciprocal out of the N^2 pass; guard max == min (reference
    # would produce NaN there).
    inv_range = jnp.where(rng > 0.0, 1.0 / rng, 0.0)
    scal = jnp.stack([min_v, inv_range]).astype(jnp.float32)

    # ---- Phase 2: exp + SpMM + row-sum + normalize ----
    out_p = pl.pallas_call(
        _agg_kernel,
        out_shape=jax.ShapeDtypeStruct((n_pad, fo_pad), jnp.float32),
        grid=(n_tiles, n_tiles),
        in_specs=[
            pl.BlockSpec((tile, fo_pad), lambda i, j: (i, 0)),   # X_prime row panel (SDDMM lhs)
            pl.BlockSpec((fo_pad, tile), lambda i, j: (0, j)),   # scaled X_prime^T (SDDMM rhs)
            pl.BlockSpec((tile, fo_pad), lambda i, j: (j, 0)),   # X_prime col panel (SpMM rhs)
            pl.BlockSpec((tile, tile), lambda i, j: (i, j)),     # adjacency tile
            pl.BlockSpec(memory_space=pltpu.MemorySpace.SMEM),   # [min_v, inv_range]
        ],
        out_specs=pl.BlockSpec((tile, fo_pad), lambda i, j: (i, 0)),
        scratch_shapes=[
            pltpu.VMEM((tile, fo_pad), jnp.float32),             # h accumulator
            pltpu.VMEM((tile, 1), jnp.float32),                  # rows_sum accumulator
        ],
        compiler_params=pltpu.CompilerParams(
            dimension_semantics=("parallel", "arbitrary")),
    )(xp, xpt, xp, adj_p, scal)

    return out_p[:N, :f_out].astype(jnp.float16)


if __name__ == "__main__":
    key = jax.random.PRNGKey(0)
    k_x, k_w, k_a, k_adj = jax.random.split(key, 4)

    N = 64            # num nodes
    input_dim = 32
    output_dim = 32

    # Parameter init mirroring AGNNConv.__init__ / reset_parameters:
    #   weights ~ U(-stdv, stdv) with stdv = 1/sqrt(output_dim); attention_w ~ N(0,1)
    stdv = 1.0 / math.sqrt(output_dim)
    weights = jax.random.uniform(k_w, (input_dim, output_dim),
                                 minval=-stdv, maxval=stdv, dtype=jnp.float32)
    attention_w = jax.random.normal(k_a, (1,), dtype=jnp.float32)

    # Node features (reference feeds fp16 features into torch.mm)
    X = jax.random.normal(k_x, (N, input_dim), dtype=jnp.float32).astype(jnp.float16)

    # Synthetic sparse graph as a dense mask: random edges + self loops
    adj = (jax.random.uniform(k_adj, (N, N)) < 0.1).astype(jnp.float32)
    adj = jnp.maximum(adj, jnp.eye(N, dtype=jnp.float32))  # self loops -> rows_sum > 0

    out = agnn_conv(X, weights, adj, attention_w)
    jax.block_until_ready(out)
    assert out.shape == (N, output_dim) and out.dtype == jnp.float16
    assert bool(jnp.all(jnp.isfinite(out.astype(jnp.float32))))
    print("KERNEL_OK")
</pallas_src>

<mosaic_0001>
module attributes {stable_mosaic.version = 11 : i64} {
  func.func @_xprime_kernel(%arg0: i32, %arg1: memref<128x128xbf16, #tpu.memory_space<vmem>>, %arg2: memref<128x128xbf16, #tpu.memory_space<vmem>>, %arg3: memref<1xf32, #tpu.memory_space<smem>>, %arg4: memref<128x128xbf16, #tpu.memory_space<vmem>>, %arg5: memref<128x128xbf16, #tpu.memory_space<vmem>>) attributes {dimension_semantics = [#tpu.dimension_semantics<parallel>], iteration_bounds = array<i64: 1>, scalar_prefetch = 0 : i64, scratch_operands = 0 : i64, tpu.core_type = #tpu.core_type<tc>, window_params = [{transform_indices = @transform_0, window_bounds = array<i64: 128, 128>}, {pipeline_mode = #tpu.pipeline_mode<synchronous>, transform_indices = @transform_1, window_bounds = array<i64: 128, 128>}, {transform_indices = @transform_2, window_bounds = array<i64: 1>}, {transform_indices = @transform_3, window_bounds = array<i64: 128, 128>}, {transform_indices = @transform_4, window_bounds = array<i64: 128, 128>}]} {
    %c0 = arith.constant 0 : index
    %c0_0 = arith.constant 0 : index
    %0 = vector.load %arg1[%c0, %c0_0] : memref<128x128xbf16, #tpu.memory_space<vmem>>, vector<128x128xbf16>
    %c0_1 = arith.constant 0 : index
    %c0_2 = arith.constant 0 : index
    %1 = vector.load %arg2[%c0_1, %c0_2] : memref<128x128xbf16, #tpu.memory_space<vmem>>, vector<128x128xbf16>
    %cst = arith.constant dense<0.000000e+00> : vector<128x128xf32>
    %2 = tpu.matmul %0, %1, %cst {dimension_numbers = #tpu.dot_dimension_numbers<[1], [0], [0], [1], [0, 0, 1, 1], [], []>} : vector<128x128xbf16>, vector<128x128xbf16>, vector<128x128xf32> -> vector<128x128xf32>
    %3 = arith.truncf %2 : vector<128x128xf32> to vector<128x128xbf16>
    %c0_3 = arith.constant 0 : index
    %c0_4 = arith.constant 0 : index
    %4 = vector.load %arg4[%c0_3, %c0_4] : memref<128x128xbf16, #tpu.memory_space<vmem>>, vector<128x128xbf16>
    tpu.vector_store %arg4[%c0_3, %c0_4], %3 {strides = array<i32>} : memref<128x128xbf16, #tpu.memory_space<vmem>>, vector<128x128xbf16>,
    %c0_5 = arith.constant 0 : index
    %5 = memref.load %arg3[%c0_5] : memref<1xf32, #tpu.memory_space<smem>>
    %6 = vector.broadcast %5 : f32 to vector<128x128xf32>
    %7 = arith.mulf %2, %6 : vector<128x128xf32>
    %8 = tpu.transpose %7, [1, 0] : vector<128x128xf32> -> vector<128x128xf32>
    %9 = arith.truncf %8 : vector<128x128xf32> to vector<128x128xbf16>
    %c0_6 = arith.constant 0 : index
    %c0_7 = arith.constant 0 : index
    %10 = vector.load %arg5[%c0_6, %c0_7] : memref<128x128xbf16, #tpu.memory_space<vmem>>, vector<128x128xbf16>
    tpu.vector_store %arg5[%c0_6, %c0_7], %9 {strides = array<i32>} : memref<128x128xbf16, #tpu.memory_space<vmem>>, vector<128x128xbf16>,
    return
  }
  func.func @transform_0(%arg0: i32) -> (i32, i32) {
    %c0_i32 = arith.constant 0 : i32
    %c0_i32_0 = arith.constant 0 : i32
    return %arg0, %c0_i32 : i32, i32
  }
  func.func @transform_1(%arg0: i32) -> (i32, i32) {
    %c0_i32 = arith.constant 0 : i32
    %c0_i32_0 = arith.constant 0 : i32
    %c0_i32_1 = arith.constant 0 : i32
    return %c0_i32, %c0_i32_0 : i32, i32
  }
  func.func @transform_2(%arg0: i32) -> i32 {
    %c0_i32 = arith.constant 0 : i32
    %c0_i32_0 = arith.constant 0 : i32
    return %c0_i32 : i32
  }
  func.func @transform_3(%arg0: i32) -> (i32, i32) {
    %c0_i32 = arith.constant 0 : i32
    %c0_i32_0 = arith.constant 0 : i32
    return %arg0, %c0_i32 : i32, i32
  }
  func.func @transform_4(%arg0: i32) -> (i32, i32) {
    %c0_i32 = arith.constant 0 : i32
    %c0_i32_0 = arith.constant 0 : i32
    return %c0_i32, %arg0 : i32, i32
  }
}

</mosaic_0001>

<bundles_post_ra>
// kernel: tpu_custom_call.1
= control target key start
LH: loop header
LB: loop body
LE: loop exit
PB: predicated region body
PF: predicated region fallthrough
CT: control target
= control target key end

     0   :  { %11 = vsyncpa [#allocation4], 0  ;;  %s764_s0 = inlined_call_operand.hbm [shape: bf16[128,128], index: 0, kind: input, shape index: {}]   ;;  %s765_s1 = inlined_call_operand.hbm [shape: bf16[128,128], index: 1, kind: input, shape index: {}]   ;;  %s766_s2 = inlined_call_operand.<no memory space> [shape: f32[1], index: 2, kind: input, shape index: {}]   ;;  %s767_s3 = inlined_call_operand.hbm [shape: bf16[128,128], index: 3, kind: output, shape index: {0}]   ;;  %s768_s4 = inlined_call_operand.hbm [shape: bf16[128,128], index: 4, kind: output, shape index: {1}]  }
   0x1   :  { %12 = vsyncpa [#allocation7], 0 }
   0x2   :  { %13 = vsyncpa [#allocation5], 0 }
   0x3   :  { %14 = vsyncpa [#allocation10], 0  ;;  %s19_s17 = sshll.u32 %s764_s0, 4  ;;  %s688_s18 = smov [#allocation3]   ;;  %s20_s17 = int_to_ptr.hbm [resolvable:$true] %s19_s17 }
   0x4   :  { %s21_s19 = sshll.u32 %s688_s18, 4  ;;  %s32_s22 = sshll.u32 %s765_s1, 4  ;;  %s22_s19 = int_to_ptr.vmem [resolvable:$true] %s21_s19  ;;  %s33_s22 = int_to_ptr.hbm [resolvable:$true] %s32_s22 }
   0x5   :  { %s689_s23 = smov 64   ;;  %s690_s24 = smov 4  }
   0x6   :  { %27 = dma.hbm_to_vmem [thread:$0]  %s20_s17, 1024, %s22_s19, [#allocation4], %s689_s23, %s689_s23, %s690_s24  }
   0x7   :  { %s691_s25 = smov [#allocation6]  }
   0x8   :  { %s34_s26 = sshll.u32 %s691_s25, 4  ;;  %s35_s26 = int_to_ptr.vmem [resolvable:$true] %s34_s26 }
   0x9   :  { %40 = dma.hbm_to_vmem [thread:$0]  %s33_s22, 1024, %s35_s26, [#allocation7], %s689_s23, %s689_s23, %s690_s24  }
   0xa   :  { %680 = dma.done.wait [#allocation4], 1024  }
   0xb   :  { %681 = vsyncadd [#allocation4], 4294966272 }
   0xc   :  { %682 = dma.done.wait [#allocation7], 1024  }
   0xd   :  { %683 = vsyncadd [#allocation7], 4294966272  ;;  %v459_v0 = vld [vmem:[#allocation6 + $0x38] sm:$0xff]  ;;  %v458_v1 = vld [vmem:[#allocation6 + $0x30] sm:$0xff]  ;;  %v734_v16 = vstv %s766_s2  ;;  %s692_s2 = smov [#allocation8]   ;;  %s348_s30 = sshll.u32 %s767_s3, 4  ;;  %s349_s30 = int_to_ptr.hbm [resolvable:$true] %s348_s30 }
   0xe   :  { %179 = vmatpush.bf16.msra.mxu0 %v459_v0  ;;  %554 = vmatpush.bf16.msra.mxu1 %v459_v0  ;;  %v457_v2 = vld [vmem:[#allocation6 + $0x28] sm:$0xff]  ;;  %v456_v3 = vld [vmem:[#allocation6 + $0x20] sm:$0xff]  ;;  %v455_v4 = vld [vmem:[#allocation6 + $0x18] sm:$0xff]  ;;  %s346_s27 = sshll.u32 %s692_s2, 4  ;;  %s693_s3 = smov [#allocation9]   ;;  %s347_s27 = int_to_ptr.vmem [resolvable:$true] %s346_s27 }
   0xf   :  { %555 = vmatpush.bf16.msra.mxu2 %v459_v0  ;;  %556 = vmatpush.bf16.msra.mxu3 %v459_v0  ;;  %v454_v5 = vld [vmem:[#allocation6 + $0x10] sm:$0xff]  ;;  %v453_v6 = vld [vmem:[#allocation6 + $0x8] sm:$0xff]  ;;  %v452_v7 = vld [vmem:[#allocation6] sm:$0xff]  ;;  %s359_s5 = sshll.u32 %s693_s3, 4  ;;  %s361_s8 = sshll.u32 %s768_s4, 4  ;;  %s360_s5 = int_to_ptr.vmem [resolvable:$true] %s359_s5  ;;  %s362_s8 = int_to_ptr.hbm [resolvable:$true] %s361_s8 }
  0x10   :  { %v444_v8 = vld [vmem:[#allocation3] sm:$0xff]  ;;  %v446_v9 = vld [vmem:[#allocation3 + $0x10] sm:$0xff]  ;;  %v445_v12 = vld [vmem:[#allocation3 + $0x8] sm:$0xff] }
  0x11   :  { %v448_v10 = vld [vmem:[#allocation3 + $0x20] sm:$0xff]  ;;  %v450_v11 = vld [vmem:[#allocation3 + $0x30] sm:$0xff]  ;;  %v447_v13 = vld [vmem:[#allocation3 + $0x18] sm:$0xff] }
  0x12   :  { %180 = vmatpush.bf16.msra.mxu0 %v458_v1  ;;  %557 = vmatpush.bf16.msra.mxu1 %v458_v1  ;;  %v449_v14 = vld [vmem:[#allocation3 + $0x28] sm:$0xff]  ;;  %v451_v15 = vld [vmem:[#allocation3 + $0x38] sm:$0xff] }
  0x13   :  { %558 = vmatpush.bf16.msra.mxu2 %v458_v1  ;;  %559 = vmatpush.bf16.msra.mxu3 %v458_v1 }
  0x16   :  { %181 = vmatpush.bf16.msra.mxu0 %v457_v2  ;;  %560 = vmatpush.bf16.msra.mxu1 %v457_v2 }
  0x17   :  { %561 = vmatpush.bf16.msra.mxu2 %v457_v2  ;;  %562 = vmatpush.bf16.msra.mxu3 %v457_v2 }
  0x1a   :  { %182 = vmatpush.bf16.msra.mxu0 %v456_v3  ;;  %563 = vmatpush.bf16.msra.mxu1 %v456_v3 }
  0x1b   :  { %564 = vmatpush.bf16.msra.mxu2 %v456_v3  ;;  %565 = vmatpush.bf16.msra.mxu3 %v456_v3 }
  0x1e   :  { %183 = vmatpush.bf16.msra.mxu0 %v455_v4  ;;  %566 = vmatpush.bf16.msra.mxu1 %v455_v4 }
  0x1f   :  { %567 = vmatpush.bf16.msra.mxu2 %v455_v4  ;;  %568 = vmatpush.bf16.msra.mxu3 %v455_v4 }
  0x22   :  { %184 = vmatpush.bf16.msra.mxu0 %v454_v5  ;;  %569 = vmatpush.bf16.msra.mxu1 %v454_v5 }
  0x23   :  { %570 = vmatpush.bf16.msra.mxu2 %v454_v5  ;;  %571 = vmatpush.bf16.msra.mxu3 %v454_v5 }
  0x26   :  { %185 = vmatpush.bf16.msra.mxu0 %v453_v6  ;;  %572 = vmatpush.bf16.msra.mxu1 %v453_v6 }
  0x27   :  { %573 = vmatpush.bf16.msra.mxu2 %v453_v6  ;;  %574 = vmatpush.bf16.msra.mxu3 %v453_v6 }
  0x2a   :  { %186 = vmatpush.bf16.msra.mxu0 %v452_v7  ;;  %575 = vmatpush.bf16.msra.mxu1 %v452_v7 }
  0x2b   :  { %576 = vmatpush.bf16.msra.mxu2 %v452_v7  ;;  %577 = vmatpush.bf16.msra.mxu3 %v452_v7 }
  0x2d   :  { %187 = vmatmul.bf16.vlgmr.msra.gmra.mxu0 %v444_v8  ;;  %197 = vmatmul.bf16.vlgmr.msra.gmra.mxu1 %v446_v9 }
  0x2e   :  { %207 = vmatmul.bf16.vlgmr.msra.gmra.mxu2 %v448_v10  ;;  %217 = vmatmul.bf16.vlgmr.msra.gmra.mxu3 %v450_v11 }
  0x3d   :  { %192 = vmatmul.bf16.gmra.mxu0 %v445_v12  ;;  %202 = vmatmul.bf16.gmra.mxu1 %v447_v13 }
  0x3e   :  { %212 = vmatmul.bf16.gmra.mxu2 %v449_v14  ;;  %222 = vmatmul.bf16.gmra.mxu3 %v451_v15 }
  0xaa   :  { %v188_v17 = vpop.f32.mrf.mxu0  ;;  %v198_v18 = vpop.f32.mrf.mxu1 }
  0xab   :  { %v262_v19 = vmul.f32 %v734_v16, %v188_v17  ;;  %v266_v36 = vmul.f32 %v734_v16, %v198_v18 }
  0xad   :  { %278 = vxpose.xlu0.b32.start [1/16] %v262_v19, 128 }
  0xb1   :  { %v208_v28 = vpop.f32.mrf.mxu2  ;;  %v218_v42 = vpop.f32.mrf.mxu3 }
  0xb2   :  { %v190_v20 = vpop.f32.mrf.mxu0  ;;  %v200_v21 = vpop.f32.mrf.mxu1  ;;  %v270_v46 = vmul.f32 %v734_v16, %v208_v28  ;;  %v274_v53 = vmul.f32 %v734_v16, %v218_v42 }
  0xb3   :  { %v463_v22 = vpack.c.bf16 %v190_v20, %v188_v17  ;;  %v263_v23 = vmul.f32 %v734_v16, %v190_v20  ;;  %v473_v24 = vpack.c.bf16 %v200_v21, %v198_v18  ;;  %v267_v38 = vmul.f32 %v734_v16, %v200_v21 }
  0xb5   :  { %464 = vst [vmem:[#allocation8] sm:$0xff] %v463_v22   ;;  %279 = vxpose.xlu0.b32.cont [2/16] %v263_v23, 128 }
  0xb6   :  { %541 = vst [vmem:[#allocation8 + $0x10] sm:$0xff] %v473_v24  }
  0xb9   :  { %v210_v34 = vpop.f32.mrf.mxu2  ;;  %v220_v44 = vpop.f32.mrf.mxu3 }
  0xba   :  { %v193_v25 = vpop.f32.mrf.mxu0  ;;  %v203_v26 = vpop.f32.mrf.mxu1  ;;  %v483_v35 = vpack.c.bf16 %v210_v34, %v208_v28  ;;  %v493_v45 = vpack.c.bf16 %v220_v44, %v218_v42  ;;  %v271_v48 = vmul.f32 %v734_v16, %v210_v34  ;;  %v275_v54 = vmul.f32 %v734_v16, %v220_v44 }
  0xbb   :  { %v264_v27 = vmul.f32 %v734_v16, %v193_v25  ;;  %v268_v41 = vmul.f32 %v734_v16, %v203_v26 }
  0xbc   :  { %543 = vst [vmem:[#allocation8 + $0x20] sm:$0xff] %v483_v35  }
  0xbd   :  { %280 = vxpose.xlu0.b32.cont [3/16] %v264_v27, 128  ;;  %545 = vst [vmem:[#allocation8 + $0x30] sm:$0xff] %v493_v45  }
  0xc1   :  { %v213_v37 = vpop.f32.mrf.mxu2  ;;  %v223_v47 = vpop.f32.mrf.mxu3 }
  0xc2   :  { %v195_v29 = vpop.f32.mrf.mxu0  ;;  %v205_v30 = vpop.f32.mrf.mxu1  ;;  %v272_v51 = vmul.f32 %v734_v16, %v213_v37  ;;  %v276_v55 = vmul.f32 %v734_v16, %v223_v47 }
  0xc3   :  { %v468_v31 = vpack.c.bf16 %v195_v29, %v193_v25  ;;  %v265_v32 = vmul.f32 %v734_v16, %v195_v29  ;;  %v478_v33 = vpack.c.bf16 %v205_v30, %v203_v26  ;;  %v269_v43 = vmul.f32 %v734_v16, %v205_v30 }
  0xc5   :  { %540 = vst [vmem:[#allocation8 + $0x8] sm:$0xff] %v468_v31   ;;  %281 = vxpose.xlu0.b32.cont [4/16] %v265_v32, 128 }
  0xc6   :  { %542 = vst [vmem:[#allocation8 + $0x18] sm:$0xff] %v478_v33  }
  0xc9   :  { %v215_v39 = vpop.f32.mrf.mxu2  ;;  %v225_v49 = vpop.f32.mrf.mxu3 }
  0xca   :  { %v488_v40 = vpack.c.bf16 %v215_v39, %v213_v37  ;;  %v498_v50 = vpack.c.bf16 %v225_v49, %v223_v47  ;;  %v273_v52 = vmul.f32 %v734_v16, %v215_v39  ;;  %v277_v56 = vmul.f32 %v734_v16, %v225_v49 }
  0xcc   :  { %544 = vst [vmem:[#allocation8 + $0x28] sm:$0xff] %v488_v40  }
  0xcd   :  { %282 = vxpose.xlu0.b32.cont [5/16] %v266_v36, 128  ;;  %546 = vst [vmem:[#allocation8 + $0x38] sm:$0xff] %v498_v50  }
  0xce   :  { %354 = dma.vmem_to_hbm [thread:$0]  %s347_s27, 1024, %s349_s30, [#allocation5], %s689_s23, %s689_s23, %s690_s24  }
  0xd5   :  { %283 = vxpose.xlu0.b32.cont [6/16] %v267_v38, 128 }
  0xdd   :  { %284 = vxpose.xlu0.b32.cont [7/16] %v268_v41, 128 }
  0xe5   :  { %285 = vxpose.xlu0.b32.cont [8/16] %v269_v43, 128 }
  0xed   :  { %286 = vxpose.xlu0.b32.cont [9/16] %v270_v46, 128 }
  0xf5   :  { %287 = vxpose.xlu0.b32.cont [10/16] %v271_v48, 128 }
  0xfd   :  { %288 = vxpose.xlu0.b32.cont [11/16] %v272_v51, 128 }
 0x105   :  { %289 = vxpose.xlu0.b32.cont [12/16] %v273_v52, 128 }
 0x10d   :  { %290 = vxpose.xlu0.b32.cont [13/16] %v274_v53, 128 }
 0x115   :  { %291 = vxpose.xlu0.b32.cont [14/16] %v275_v54, 128 }
 0x11d   :  { %292 = vxpose.xlu0.b32.cont [15/16] %v276_v55, 128 }
 0x125   :  { %293 = vxpose.xlu0.b32.end [16/16] %v277_v56, 128 }
 0x151   :  { %v294_v57 = vpop.trf.xlu0 }
 0x159   :  { %v295_v58 = vpop.trf.xlu0 }
 0x15a   :  { %v503_v59 = vpack.c.bf16 %v295_v58, %v294_v57 }
 0x15c   :  { %504 = vst [vmem:[#allocation9] sm:$0xff] %v503_v59  }
 0x161   :  { %v296_v60 = vpop.trf.xlu0 }
 0x169   :  { %v297_v61 = vpop.trf.xlu0 }
 0x16a   :  { %v508_v62 = vpack.c.bf16 %v297_v61, %v296_v60 }
 0x16c   :  { %547 = vst [vmem:[#allocation9 + $0x8] sm:$0xff] %v508_v62  }
 0x171   :  { %v298_v63 = vpop.trf.xlu0 }
 0x179   :  { %v299_v0 = vpop.trf.xlu0 }
 0x17a   :  { %v513_v1 = vpack.c.bf16 %v299_v0, %v298_v63 }
 0x17c   :  { %548 = vst [vmem:[#allocation9 + $0x10] sm:$0xff] %v513_v1  }
 0x181   :  { %v300_v2 = vpop.trf.xlu0 }
 0x189   :  { %v301_v3 = vpop.trf.xlu0 }
 0x18a   :  { %v518_v4 = vpack.c.bf16 %v301_v3, %v300_v2 }
 0x18c   :  { %549 = vst [vmem:[#allocation9 + $0x18] sm:$0xff] %v518_v4  }
 0x191   :  { %v302_v5 = vpop.trf.xlu0 }
 0x199   :  { %v303_v6 = vpop.trf.xlu0 }
 0x19a   :  { %v523_v7 = vpack.c.bf16 %v303_v6, %v302_v5 }
 0x19c   :  { %550 = vst [vmem:[#allocation9 + $0x20] sm:$0xff] %v523_v7  }
 0x1a1   :  { %v304_v8 = vpop.trf.xlu0 }
 0x1a9   :  { %v305_v9 = vpop.trf.xlu0 }
 0x1aa   :  { %v528_v10 = vpack.c.bf16 %v305_v9, %v304_v8 }
 0x1ac   :  { %551 = vst [vmem:[#allocation9 + $0x28] sm:$0xff] %v528_v10  }
 0x1b1   :  { %v306_v11 = vpop.trf.xlu0 }
 0x1b9   :  { %v307_v12 = vpop.trf.xlu0 }
 0x1ba   :  { %v533_v13 = vpack.c.bf16 %v307_v12, %v306_v11 }
 0x1bc   :  { %552 = vst [vmem:[#allocation9 + $0x30] sm:$0xff] %v533_v13  }
 0x1c1   :  { %v308_v14 = vpop.trf.xlu0 }
 0x1c9   :  { %v309_v15 = vpop.trf.xlu0 }
 0x1ca   :  { %v538_v16 = vpack.c.bf16 %v309_v15, %v308_v14 }
 0x1cc   :  { %553 = vst [vmem:[#allocation9 + $0x38] sm:$0xff] %v538_v16  }
 0x1cd   :  { %367 = dma.vmem_to_hbm [thread:$0]  %s360_s5, 1024, %s362_s8, [#allocation10], %s689_s23, %s689_s23, %s690_s24  }
 0x1ce   :  { %684 = dma.done.wait [#allocation5], 1024  }
 0x1cf   :  { %685 = vsyncadd [#allocation5], 4294966272 }
 0x1d0   :  { %686 = dma.done.wait [#allocation10], 1024  }
 0x1d1   :  { %687 = vsyncadd [#allocation10], 4294966272 }
 0x1d2   :  { %376 = vsyncpa [#allocation4], 1 }
 0x1d3   :  { %377 = vsyncpa [#allocation7], 1 }
 0x1d4   :  { %378 = vsyncpa [#allocation5], 1 }
 0x1d5   :  { %379 = vsyncpa [#allocation10], 1 }

</bundles_post_ra>
